<compile_context>
chip_gen: v7x
topology: tpu7x:2x2x1
jax: 0.10.0
libtpu: 0.0.40
codegen_flags: <defaults>
</compile_context>

<pallas_src>
import functools

import jax
import jax.numpy as jnp
from jax.experimental import pallas as pl
from jax.experimental.pallas import tpu as pltpu


def _round_up(n: int, m: int) -> int:
    return ((n + m - 1) // m) * m


# ---------------------------------------------------------------------------
# Fused kernel: whole MLP in one pallas_call, 4 inputs total
# ---------------------------------------------------------------------------
def _make_fused_discriminator_kernel(dins, douts, row_offs, batch, output_dim):
    inv_b = 1.0 / float(batch)
    inv_bd = 1.0 / float(batch * output_dim)
    num_hidden = len(dins)
    d_last = douts[-1]

    def kernel(x_ref, w_ref, small_ref, bmean_ref, o_ref):
        h = x_ref[...]  # [B, Din], f32
        for l in range(num_hidden):
            din, dout, off = dins[l], douts[l], row_offs[l]

            # Linear (bias dropped: exactly cancelled by batch-stat BatchNorm).
            w = w_ref[off:off + din, 0:dout]                       # static slice
            y = jnp.dot(h, w, preferred_element_type=jnp.float32)  # MXU, f32 acc

            # BatchNorm1d (training mode, biased variance, eps=1e-5) with
            # independent first/second moments -> the two sublane reductions
            # are not serialized behind a subtract.
            mu = jnp.sum(y, axis=0, keepdims=True) * inv_b         # [1, Dout]
            ms = jnp.sum(y * y, axis=0, keepdims=True) * inv_b     # [1, Dout]
            var = jnp.maximum(ms - mu * mu, 0.0)
            gamma = small_ref[2 * l:2 * l + 1, 0:dout]              # [1, Dout]
            beta = small_ref[2 * l + 1:2 * l + 2, 0:dout]           # [1, Dout]
            z = gamma * (y - mu) * jax.lax.rsqrt(var + 1e-5) + beta

            # LeakyReLU(0.01) as a single vmax.
            h = jnp.maximum(z, 0.01 * z)                            # [B, Dout]

        # Final Linear + global mean, using the init-time colsum(W_out):
        #   mean(h @ W_out^T + b_out)
        #     = sum(h * colsum(W_out)) / (B*Dout) + mean(b_out)
        w_colsum = small_ref[2 * num_hidden:2 * num_hidden + 1, 0:d_last]
        total = jnp.sum(h * w_colsum)                               # scalar
        o_ref[0, 0] = total * inv_bd + bmean_ref[0, 0]

    return kernel


# ---------------------------------------------------------------------------
# One-time parameter packing (NOT per-call wrapper work)
# ---------------------------------------------------------------------------
def pack_discriminator_params(hidden_params, out_params):
    dins = tuple(int(p["w"].shape[0]) for p in hidden_params)
    douts = tuple(int(p["w"].shape[1]) for p in hidden_params)
    num_hidden = len(hidden_params)
    dout_max = max(douts)

    # All hidden-layer weights stacked into ONE VMEM buffer, 8-row aligned so
    # the kernel's static slices stay sublane-aligned.
    row_offs, blocks, off = [], [], 0
    for p in hidden_params:
        din, dout = p["w"].shape
        din_pad = _round_up(din, 8)
        row_offs.append(off)
        blk = jnp.zeros((din_pad, dout_max), jnp.float32).at[:din, :dout].set(p["w"])
        blocks.append(blk)
        off += din_pad
    w_pack = jnp.concatenate(blocks, axis=0)

    # gamma / beta per layer + colsum(W_out) packed as rows of one small buffer.
    small = jnp.zeros((2 * num_hidden + 1, dout_max), jnp.float32)
    for l, p in enumerate(hidden_params):
        dout = p["w"].shape[1]
        small = small.at[2 * l, :dout].set(p["gamma"].reshape(-1))
        small = small.at[2 * l + 1, :dout].set(p["beta"].reshape(-1))
    w_out, b_out = out_params                       # [Dout, Dlast], [1, Dout]
    d_last = int(w_out.shape[1])
    small = small.at[2 * num_hidden, :d_last].set(jnp.sum(w_out, axis=0))

    b_mean = jnp.mean(b_out).reshape(1, 1).astype(jnp.float32)   # SMEM scalar

    meta = dict(dins=dins, douts=douts, row_offs=tuple(row_offs),
                output_dim=int(w_out.shape[0]))
    return (w_pack, small, b_mean), meta


# ---------------------------------------------------------------------------
# Wrapper (single pallas_call for the whole forward pass, 4 input DMAs)
# ---------------------------------------------------------------------------
@functools.partial(jax.jit, static_argnames=("dins", "douts", "row_offs", "output_dim"))
def discriminator_forward(x, w_pack, small_pack, b_mean, *, dins, douts,
                          row_offs, output_dim):
    batch = x.shape[0]
    kernel = _make_fused_discriminator_kernel(dins, douts, row_offs, batch, output_dim)
    vmem = pl.BlockSpec(memory_space=pltpu.VMEM)
    smem = pl.BlockSpec(memory_space=pltpu.SMEM)

    out = pl.pallas_call(
        kernel,
        out_shape=jax.ShapeDtypeStruct((1, 1), jnp.float32),
        in_specs=[vmem, vmem, vmem, smem],
        out_specs=smem,                               # scalar out via SMEM
        compiler_params=pltpu.CompilerParams(
            # Explicit, v7x-safe (64 MiB physical / 32 MiB scoped default) budget.
            vmem_limit_bytes=32 * 1024 * 1024,
        ),
    )(x, w_pack, small_pack, b_mean)
    return out[0, 0]


# ---------------------------------------------------------------------------
# Deterministic parameter init (mirrors the PyTorch module's parameters)
# ---------------------------------------------------------------------------
def init_discriminator_params(key, input_dim, layer_sizes, output_dim=1):
    params = []
    dims = (input_dim,) + tuple(layer_sizes)
    for i in range(len(layer_sizes)):
        din, dout = dims[i], dims[i + 1]
        key, kw, kb, kg, kbeta = jax.random.split(key, 5)
        scale = 1.0 / jnp.sqrt(din)
        w = jax.random.uniform(kw, (din, dout), jnp.float32, -scale, scale)
        b = jax.random.uniform(kb, (1, dout), jnp.float32, -scale, scale)
        # BatchNorm affine params (jittered so the affine path is exercised).
        gamma = 1.0 + 0.1 * jax.random.normal(kg, (1, dout), jnp.float32)
        beta = 0.1 * jax.random.normal(kbeta, (1, dout), jnp.float32)
        params.append({"w": w, "b": b, "gamma": gamma, "beta": beta})
    # final Linear — PyTorch layout [out_features, in_features]
    din = layer_sizes[-1]
    key, kw, kb = jax.random.split(key, 3)
    scale = 1.0 / jnp.sqrt(din)
    w_out = jax.random.uniform(kw, (output_dim, din), jnp.float32, -scale, scale)
    b_out = jax.random.uniform(kb, (1, output_dim), jnp.float32, -scale, scale)
    return params, (w_out, b_out)


# ---------------------------------------------------------------------------
# Pure-JAX reference (full PyTorch train-mode math, bias INCLUDED) for checking
# ---------------------------------------------------------------------------
def discriminator_ref(x, hidden_params, out_params):
    h = x
    for p in hidden_params:
        y = h @ p["w"] + p["b"]
        mu = jnp.mean(y, axis=0, keepdims=True)
        var = jnp.mean((y - mu) ** 2, axis=0, keepdims=True)
        z = p["gamma"] * (y - mu) * jax.lax.rsqrt(var + 1e-5) + p["beta"]
        h = jnp.where(z >= 0.0, z, 0.01 * z)
    w_out, b_out = out_params
    return jnp.mean(h @ w_out.T + b_out)


if __name__ == "__main__":
    key = jax.random.PRNGKey(0)
    k_param, k_x = jax.random.split(key)

    batch = 8
    input_dim = 16
    layer_sizes = (32, 16)
    output_dim = 1

    hidden_params, out_params = init_discriminator_params(
        k_param, input_dim, layer_sizes, output_dim
    )
    x = jax.random.normal(k_x, (batch, input_dim), jnp.float32)

    packed, meta = pack_discriminator_params(hidden_params, out_params)
    w_pack, small_pack, b_mean = packed

    out = discriminator_forward(x, w_pack, small_pack, b_mean, **meta)
    out = jax.block_until_ready(out)

    ref = discriminator_ref(x, hidden_params, out_params)
    assert out.shape == (), f"expected scalar, got shape {out.shape}"
    assert jnp.allclose(out, ref, atol=1e-4, rtol=1e-4), (out, ref)

    print("KERNEL_OK")
</pallas_src>

<mosaic_0001>
module attributes {stable_mosaic.version = 11 : i64} {
  func.func @kernel(%arg0: memref<8x16xf32, #tpu.memory_space<vmem>>, %arg1: memref<48x32xf32, #tpu.memory_space<vmem>>, %arg2: memref<5x32xf32, #tpu.memory_space<vmem>>, %arg3: memref<1x1xf32, #tpu.memory_space<smem>>, %arg4: memref<1x1xf32, #tpu.memory_space<smem>>) attributes {dimension_semantics = [], scalar_prefetch = 0 : i64, scratch_operands = 0 : i64, tpu.core_type = #tpu.core_type<tc>} {
    %c0 = arith.constant 0 : index
    %c0_0 = arith.constant 0 : index
    %0 = vector.load %arg0[%c0, %c0_0] : memref<8x16xf32, #tpu.memory_space<vmem>>, vector<8x16xf32>
    %c0_1 = arith.constant 0 : index
    %c0_2 = arith.constant 0 : index
    %1 = vector.load %arg1[%c0_1, %c0_2] : memref<48x32xf32, #tpu.memory_space<vmem>>, vector<16x32xf32>
    %cst = arith.constant dense<0.000000e+00> : vector<8x32xf32>
    %2 = tpu.matmul %0, %1, %cst {dimension_numbers = #tpu.dot_dimension_numbers<[1], [0], [0], [1], [0, 0, 1, 1], [], []>} : vector<8x16xf32>, vector<16x32xf32>, vector<8x32xf32> -> vector<8x32xf32>
    %cst_3 = arith.constant dense<0.000000e+00> : vector<32xf32>
    %3 = vector.multi_reduction <add>, %2, %cst_3 [0] : vector<8x32xf32> to vector<32xf32>
    %4 = vector.shape_cast %3 : vector<32xf32> to vector<1x32xf32>
    %cst_4 = arith.constant 1.250000e-01 : f32
    %5 = vector.broadcast %cst_4 : f32 to vector<1x32xf32>
    %6 = arith.mulf %4, %5 : vector<1x32xf32>
    %7 = arith.mulf %2, %2 : vector<8x32xf32>
    %cst_5 = arith.constant dense<0.000000e+00> : vector<32xf32>
    %8 = vector.multi_reduction <add>, %7, %cst_5 [0] : vector<8x32xf32> to vector<32xf32>
    %9 = vector.shape_cast %8 : vector<32xf32> to vector<1x32xf32>
    %cst_6 = arith.constant 1.250000e-01 : f32
    %10 = vector.broadcast %cst_6 : f32 to vector<1x32xf32>
    %11 = arith.mulf %9, %10 : vector<1x32xf32>
    %12 = arith.mulf %6, %6 : vector<1x32xf32>
    %13 = arith.subf %11, %12 : vector<1x32xf32>
    %cst_7 = arith.constant 0.000000e+00 : f32
    %14 = vector.broadcast %cst_7 : f32 to vector<1x32xf32>
    %15 = arith.maximumf %13, %14 : vector<1x32xf32>
    %c0_8 = arith.constant 0 : index
    %c0_9 = arith.constant 0 : index
    %16 = vector.load %arg2[%c0_8, %c0_9] : memref<5x32xf32, #tpu.memory_space<vmem>>, vector<1x32xf32>
    %c1 = arith.constant 1 : index
    %c0_10 = arith.constant 0 : index
    %17 = vector.load %arg2[%c1, %c0_10] : memref<5x32xf32, #tpu.memory_space<vmem>>, vector<1x32xf32>
    %18 = vector.broadcast %6 : vector<1x32xf32> to vector<8x32xf32>
    %19 = arith.subf %2, %18 : vector<8x32xf32>
    %20 = vector.broadcast %16 : vector<1x32xf32> to vector<8x32xf32>
    %21 = arith.mulf %20, %19 : vector<8x32xf32>
    %cst_11 = arith.constant 9.99999974E-6 : f32
    %22 = vector.broadcast %cst_11 : f32 to vector<1x32xf32>
    %23 = arith.addf %15, %22 : vector<1x32xf32>
    %24 = math.rsqrt %23 : vector<1x32xf32>
    %25 = vector.broadcast %24 : vector<1x32xf32> to vector<8x32xf32>
    %26 = arith.mulf %21, %25 : vector<8x32xf32>
    %27 = vector.broadcast %17 : vector<1x32xf32> to vector<8x32xf32>
    %28 = arith.addf %26, %27 : vector<8x32xf32>
    %cst_12 = arith.constant 0.00999999977 : f32
    %29 = vector.broadcast %cst_12 : f32 to vector<8x32xf32>
    %30 = arith.mulf %29, %28 : vector<8x32xf32>
    %31 = arith.maximumf %28, %30 : vector<8x32xf32>
    %c16 = arith.constant 16 : index
    %c0_13 = arith.constant 0 : index
    %32 = vector.load %arg1[%c16, %c0_13] : memref<48x32xf32, #tpu.memory_space<vmem>>, vector<32x16xf32>
    %cst_14 = arith.constant dense<0.000000e+00> : vector<8x16xf32>
    %33 = tpu.matmul %31, %32, %cst_14 {dimension_numbers = #tpu.dot_dimension_numbers<[1], [0], [0], [1], [0, 0, 1, 1], [], []>} : vector<8x32xf32>, vector<32x16xf32>, vector<8x16xf32> -> vector<8x16xf32>
    %cst_15 = arith.constant dense<0.000000e+00> : vector<16xf32>
    %34 = vector.multi_reduction <add>, %33, %cst_15 [0] : vector<8x16xf32> to vector<16xf32>
    %35 = vector.shape_cast %34 : vector<16xf32> to vector<1x16xf32>
    %cst_16 = arith.constant 1.250000e-01 : f32
    %36 = vector.broadcast %cst_16 : f32 to vector<1x16xf32>
    %37 = arith.mulf %35, %36 : vector<1x16xf32>
    %38 = arith.mulf %33, %33 : vector<8x16xf32>
    %cst_17 = arith.constant dense<0.000000e+00> : vector<16xf32>
    %39 = vector.multi_reduction <add>, %38, %cst_17 [0] : vector<8x16xf32> to vector<16xf32>
    %40 = vector.shape_cast %39 : vector<16xf32> to vector<1x16xf32>
    %cst_18 = arith.constant 1.250000e-01 : f32
    %41 = vector.broadcast %cst_18 : f32 to vector<1x16xf32>
    %42 = arith.mulf %40, %41 : vector<1x16xf32>
    %43 = arith.mulf %37, %37 : vector<1x16xf32>
    %44 = arith.subf %42, %43 : vector<1x16xf32>
    %cst_19 = arith.constant 0.000000e+00 : f32
    %45 = vector.broadcast %cst_19 : f32 to vector<1x16xf32>
    %46 = arith.maximumf %44, %45 : vector<1x16xf32>
    %c2 = arith.constant 2 : index
    %c0_20 = arith.constant 0 : index
    %47 = vector.load %arg2[%c2, %c0_20] : memref<5x32xf32, #tpu.memory_space<vmem>>, vector<1x16xf32>
    %c3 = arith.constant 3 : index
    %c0_21 = arith.constant 0 : index
    %48 = vector.load %arg2[%c3, %c0_21] : memref<5x32xf32, #tpu.memory_space<vmem>>, vector<1x16xf32>
    %49 = vector.broadcast %37 : vector<1x16xf32> to vector<8x16xf32>
    %50 = arith.subf %33, %49 : vector<8x16xf32>
    %51 = vector.broadcast %47 : vector<1x16xf32> to vector<8x16xf32>
    %52 = arith.mulf %51, %50 : vector<8x16xf32>
    %cst_22 = arith.constant 9.99999974E-6 : f32
    %53 = vector.broadcast %cst_22 : f32 to vector<1x16xf32>
    %54 = arith.addf %46, %53 : vector<1x16xf32>
    %55 = math.rsqrt %54 : vector<1x16xf32>
    %56 = vector.broadcast %55 : vector<1x16xf32> to vector<8x16xf32>
    %57 = arith.mulf %52, %56 : vector<8x16xf32>
    %58 = vector.broadcast %48 : vector<1x16xf32> to vector<8x16xf32>
    %59 = arith.addf %57, %58 : vector<8x16xf32>
    %cst_23 = arith.constant 0.00999999977 : f32
    %60 = vector.broadcast %cst_23 : f32 to vector<8x16xf32>
    %61 = arith.mulf %60, %59 : vector<8x16xf32>
    %62 = arith.maximumf %59, %61 : vector<8x16xf32>
    %c4 = arith.constant 4 : index
    %c0_24 = arith.constant 0 : index
    %63 = vector.load %arg2[%c4, %c0_24] : memref<5x32xf32, #tpu.memory_space<vmem>>, vector<1x16xf32>
    %64 = vector.broadcast %63 : vector<1x16xf32> to vector<8x16xf32>
    %65 = arith.mulf %62, %64 : vector<8x16xf32>
    %66 = vector.shape_cast %65 : vector<8x16xf32> to vector<1x8x16xf32>
    %cst_25 = arith.constant dense<0.000000e+00> : vector<1xf32>
    %67 = vector.multi_reduction <add>, %66, %cst_25 [1, 2] : vector<1x8x16xf32> to vector<1xf32>
    %68 = vector.shape_cast %67 : vector<1xf32> to vector<1x1x1xf32>
    %69 = vector.extract %68[0, 0, 0] : f32 from vector<1x1x1xf32>
    %cst_26 = arith.constant 1.250000e-01 : f32
    %70 = arith.mulf %69, %cst_26 : f32
    %c0_27 = arith.constant 0 : index
    %c0_28 = arith.constant 0 : index
    %71 = memref.load %arg3[%c0_27, %c0_28] : memref<1x1xf32, #tpu.memory_space<smem>>
    %72 = arith.addf %70, %71 : f32
    %c0_29 = arith.constant 0 : index
    %c0_30 = arith.constant 0 : index
    %73 = memref.load %arg4[%c0_29, %c0_30] : memref<1x1xf32, #tpu.memory_space<smem>>
    memref.store %72, %arg4[%c0_29, %c0_30] : memref<1x1xf32, #tpu.memory_space<smem>>
    return
  }
}

</mosaic_0001>

<bundles_post_ra>
// kernel: discriminator_forward.1
= control target key start
LH: loop header
LB: loop body
LE: loop exit
PB: predicated region body
PF: predicated region fallthrough
CT: control target
= control target key end

     0   :  { %v348_v2 = vmov 0.0|0.0   ;;  %vm349_vm0 = vmmov 0   ;;  %v350_v4 = vmov 0.0   ;;  %s435_s0 = inlined_call_operand.vmem [shape: f32[8,16], index: 0, kind: input, shape index: {}]   ;;  %s436_s1 = inlined_call_operand.vmem [shape: f32[48,32], index: 1, kind: input, shape index: {}]   ;;  %s437_s2 = inlined_call_operand.vmem [shape: f32[5,32], index: 2, kind: input, shape index: {}]   ;;  %s438_s3 = inlined_call_operand.<no memory space> [shape: f32[1,1], index: 3, kind: input, shape index: {}]   ;;  %s439_s4 = inlined_call_operand.hbm [shape: f32[1,1], index: 4, kind: output, shape index: {}]  }
   0x1   :  { %v20_v0 = vld [vmem:[%s436_s1] sm:$0xff]  ;;  %v21_v1 = vld [vmem:[%s436_s1 + $0x8] sm:$0xff]  ;;  %317 = vmatprep.subr.bf16.mxu0 %v348_v2  ;;  %303 = vmatprep.mubr.msk.f32.mxu0 %vm349_vm0, %v350_v4 }
   0x2   :  { %v318_v3 = vpack.c.bf16 %v21_v1, %v20_v0 }
   0x3   :  { %10 = vsyncpa [#allocation4], 0  ;;  %320 = vmatprep.subr.bf16.mxu1 %v348_v2  ;;  %314 = vmatprep.mubr.msk.f32.mxu1 %vm349_vm0, %v350_v4  ;;  %v19_v5 = vld [vmem:[%s435_s0] sm:$0xff]  ;;  %vm22_vm1 = vcmask 130048   ;;  %v135_v6 = vld [vmem:[%s436_s1 + $0x10] sm:$0xff]  ;;  %vm96_vm2 = vcmask 261120  }
   0x4   :  { %319 = vmatpush3.bf16.msra.mxu0 %v318_v3  ;;  %v136_v7 = vld [vmem:[%s436_s1 + $0x18] sm:$0xff]  ;;  %v137_v9 = vld [vmem:[%s436_s1 + $0x20] sm:$0xff]  ;;  %v138_v10 = vld [vmem:[%s436_s1 + $0x28] sm:$0xff]  ;;  %s336_s17 = scalar_lea.hbm %s439_s4, 16 }
   0x5   :  { %v321_v8 = vpack.c.bf16 %v136_v7, %v135_v6  ;;  %v324_v11 = vpack.c.bf16 %v138_v10, %v137_v9  ;;  %v285_v36 = vld [vmem:[%s437_s2] ss:$0 sm:$0xff]  ;;  %v286_v39 = vld [vmem:[%s437_s2 + $0x1] ss:$0 sm:$0xff]  ;;  %v288_v4 = vld [vmem:[%s437_s2 + $0x2] ss:$0 sm:$0xff]  ;;  %p337_p0 = scmp.ne.s32.totalorder %s439_s4, %s336_s17  ;;  %p340_p1 = scmp.lt.u32.totalorder %s336_s17, %s439_s4 }
   0x6   :  { %v289_v7 = vld [vmem:[%s437_s2 + $0x3] ss:$0 sm:$0xff] }
   0x7   :  { %304 = vmatmul.mubr.msk.f32.vlgmr.msra.gmra.mrb[0].mxu0 %vm22_vm1, %v19_v5  ;;  %322 = vmatpush3.bf16.msra.mxu1 %v321_v8  ;;  %p342_p2 = pnand %p340_p1, %p337_p0 }
   0x8   :  { %323 = vmatprep.subr.bf16.mxu1 %v348_v2 }
   0xb   :  { %325 = vmatpush3.bf16.msra.mxu1 %v324_v11  ;;  %v290_v11 = vld [vmem:[%s437_s2 + $0x4] ss:$0 sm:$0xff] }
  0xda   :  { %v92_v12 = vpop.f32.mrb[0].mxu0 }
  0xdb   :  { %v97_v13 = vsel %vm96_vm2, %v92_v12, 0.0  ;;  %v105_v14 = vmul.f32 %v92_v12, %v92_v12  ;;  %v305_v15 = vpop.f32.mrb[1].mxu0 }
  0xdc   :  { %v98_v16 = vrot.slane %v97_v13, 4 }
  0xdd   :  { %v106_v17 = vsel %vm96_vm2, %v105_v14, 0.0 }
  0xde   :  { %v99_v18 = vadd.f32 %v98_v16, %v97_v13  ;;  %v107_v19 = vrot.slane %v106_v17, 4 }
  0xe0   :  { %v100_v20 = vrot.slane %v99_v18, 2  ;;  %v108_v21 = vadd.f32 %v107_v19, %v106_v17 }
  0xe2   :  { %v101_v22 = vadd.f32 %v100_v20, %v99_v18  ;;  %v109_v23 = vrot.slane %v108_v21, 2 }
  0xe4   :  { %v102_v24 = vrot.slane %v101_v22, 1  ;;  %v110_v25 = vadd.f32 %v109_v23, %v108_v21 }
  0xe6   :  { %v103_v26 = vadd.f32 %v102_v24, %v101_v22  ;;  %v111_v27 = vrot.slane %v110_v25, 1 }
  0xe8   :  { %v104_v28 = vmul.f32 0.125, %v103_v26  ;;  %v112_v29 = vadd.f32 %v111_v27, %v110_v25 }
  0xea   :  { %v113_v30 = vmul.f32 0.125, %v112_v29  ;;  %v114_v31 = vmul.f32 %v104_v28, %v104_v28  ;;  %v119_v35 = vsub.f32 %v92_v12, %v104_v28 }
  0xec   :  { %v115_v32 = vsub.f32 %v113_v30, %v114_v31  ;;  %v124_v37 = vmul.f32 %v285_v36, %v119_v35 }
  0xee   :  { %v116_v33 = vmax.f32 %v115_v32, 0.0 }
  0xf0   :  { %v125_v34 = vadd.f32 1e-05, %v116_v33 }
  0xf2   :  { %332 = vrsqrt.f32 %v125_v34 }
  0xfc   :  { %v333_v38 = vpop.eup %332 }
  0xfd   :  { %v127_v40 = vmul.f32 %v333_v38, %v124_v37 }
  0xff   :  { %v132_v41 = vadd.f32 %v286_v39, %v127_v40 }
 0x101   :  { %v133_v42 = vmul.f32 0.01, %v132_v41 }
 0x103   :  { %v134_v43 = vmax.f32 %v132_v41, %v133_v42 }
 0x105   :  { %315 = vmatmul.mubr.msk.f32.vlgmr.msra.gmra.mrb[0].mxu1 %vm96_vm2, %v134_v43 }
 0x1d8   :  { %v208_v44 = vpop.f32.mrb[0].mxu1 }
 0x1d9   :  { %v212_v45 = vsel %vm22_vm1, %v208_v44, 0.0  ;;  %v220_v46 = vmul.f32 %v208_v44, %v208_v44  ;;  %v316_v47 = vpop.f32.mrb[1].mxu1 }
 0x1da   :  { %v213_v48 = vrot.slane %v212_v45, 4 }
 0x1db   :  { %v221_v49 = vsel %vm22_vm1, %v220_v46, 0.0 }
 0x1dc   :  { %v214_v50 = vadd.f32 %v213_v48, %v212_v45  ;;  %v222_v51 = vrot.slane %v221_v49, 4 }
 0x1de   :  { %v215_v52 = vrot.slane %v214_v50, 2  ;;  %v223_v53 = vadd.f32 %v222_v51, %v221_v49 }
 0x1e0   :  { %v216_v54 = vadd.f32 %v215_v52, %v214_v50  ;;  %v224_v55 = vrot.slane %v223_v53, 2 }
 0x1e2   :  { %v217_v56 = vrot.slane %v216_v54, 1  ;;  %v225_v57 = vadd.f32 %v224_v55, %v223_v53 }
 0x1e4   :  { %v218_v58 = vadd.f32 %v217_v56, %v216_v54  ;;  %v226_v59 = vrot.slane %v225_v57, 1 }
 0x1e6   :  { %v219_v60 = vmul.f32 0.125, %v218_v58  ;;  %v227_v61 = vadd.f32 %v226_v59, %v225_v57 }
 0x1e8   :  { %v228_v62 = vmul.f32 0.125, %v227_v61  ;;  %v229_v63 = vmul.f32 %v219_v60, %v219_v60  ;;  %v234_v3 = vsub.f32 %v208_v44, %v219_v60 }
 0x1ea   :  { %v230_v0 = vsub.f32 %v228_v62, %v229_v63  ;;  %v239_v5 = vmul.f32 %v288_v4, %v234_v3 }
 0x1ec   :  { %v231_v1 = vmax.f32 %v230_v0, 0.0 }
 0x1ee   :  { %v240_v2 = vadd.f32 1e-05, %v231_v1 }
 0x1f0   :  { %334 = vrsqrt.f32 %v240_v2 }
 0x1fa   :  { %v335_v6 = vpop.eup %334 }
 0x1fb   :  { %v242_v8 = vmul.f32 %v335_v6, %v239_v5 }
 0x1fd   :  { %v247_v9 = vadd.f32 %v289_v7, %v242_v8 }
 0x1ff   :  { %v248_v10 = vmul.f32 0.01, %v247_v9 }
 0x201   :  { %v249_v12 = vmax.f32 %v247_v9, %v248_v10 }
 0x203   :  { %v255_v13 = vmul.f32 %v290_v11, %v249_v12 }
 0x205   :  { %v256_v14 = vsel %vm22_vm1, %v255_v13, 0.0 }
 0x206   :  { %257 = vadd.xlane.f32.xlu0 %v256_v14 }
 0x293   :  { %v258_v15 = vpop.xlane.xlu0 %257 }
 0x294   :  { %v259_v16 = vrot.slane %v258_v15, 4 }
 0x296   :  { %v260_v17 = vadd.f32 %v259_v16, %v258_v15 }
 0x298   :  { %v261_v18 = vrot.slane %v260_v17, 2 }
 0x29a   :  { %v262_v19 = vadd.f32 %v261_v18, %v260_v17 }
 0x29c   :  { %v263_v20 = vrot.slane %v262_v19, 1 }
 0x29e   :  { %v264_v21 = vadd.f32 %v263_v20, %v262_v19 }
 0x2a0   :  { %326 = vpush %v264_v21 }
 0x2d1   :  { %s327_s11 = spop %326 }
 0x2d2   :  { %s266_s12 = smul.f32 0.125, %s327_s11 }
 0x2d4   :  { %s268_s15 = sadd.f32 %s266_s12, %s438_s3 }
 0x2d6   :  { %270 = sst [smem:[#allocation3]] %s268_s15 }
 0x2d7   :  { %345 = shalt.err (!%p342_p2)
}
 0x2d8   :  { %s351_s22 = smov [#allocation3]  }
 0x2d9   :  { %278 = dma.smem_to_hbm %s351_s22, 16, %s439_s4, [#allocation4]  }
 0x2da   :  { %346 = dma.done.wait [#allocation4], 16  }
 0x2db   :  { %347 = vsyncadd [#allocation4], 4294967280 }
 0x2dc   :  { %282 = sfence }
 0x2dd   :  { %283 = vsyncpa [#allocation4], 1 }

</bundles_post_ra>
